<compile_context>
chip_gen: v6e
topology: v6e:2x2x1
jax: 0.10.0
libtpu: 0.0.40
codegen_flags: <defaults>
</compile_context>

<pallas_src>
import jax
import jax.numpy as jnp
from jax.experimental import pallas as pl
from jax.experimental.pallas import tpu as pltpu


_VMEM = pl.BlockSpec(memory_space=pltpu.MemorySpace.VMEM)


# ----------------------------------------------------------------------------
# Encoder: im2col matmul + ReLU kernel (single full block)
# ----------------------------------------------------------------------------
def _enc_matmul_kernel(p_ref, w_ref, b_ref, o_ref):
    acc = jnp.dot(p_ref[...], w_ref[...], preferred_element_type=jnp.float32)
    o_ref[...] = jnp.maximum(acc + b_ref[...], 0.0)


def encoder_forward(params, images, *, pool_size=4):
    """images: (B, Cin, H, W) NCHW float32 -> encoder_out (B, pool_size**2, enc_dim)."""
    B, Cin, H, W = images.shape
    enc_dim = params["conv_w"].shape[-1]

    # --- glue: NCHW -> NHWC, pad, im2col ---
    x = jnp.transpose(images, (0, 2, 3, 1))                       # (B, H, W, Cin)
    xp = jnp.pad(x, ((0, 0), (1, 1), (1, 1), (0, 0)))
    patches = jnp.stack(
        [xp[:, i:i + H, j:j + W, :] for i in range(3) for j in range(3)], axis=3
    )                                                             # (B, H, W, 9, Cin)
    patches = patches.reshape(B * H * W, 9 * Cin)                 # (N, K)
    N, K = patches.shape

    w_flat = params["conv_w"].reshape(9 * Cin, enc_dim)           # (K, enc_dim)
    b_flat = params["conv_b"].reshape(1, enc_dim)

    # Whole problem fits VMEM comfortably at these sizes -> single block, no grid.
    # For large images, reintroduce a row-tiled grid with a big tile_m (>=512).
    out = pl.pallas_call(
        _enc_matmul_kernel,
        out_shape=jax.ShapeDtypeStruct((N, enc_dim), jnp.float32),
        in_specs=[_VMEM, _VMEM, _VMEM],
        out_specs=_VMEM,
    )(patches, w_flat, b_flat)

    # --- glue: adaptive avg pool to (pool_size, pool_size), flatten pixels ---
    feat = out.reshape(B, H, W, enc_dim)
    fh, fw = H // pool_size, W // pool_size
    feat = feat.reshape(B, pool_size, fh, pool_size, fw, enc_dim).mean(axis=(2, 4))
    return feat.reshape(B, pool_size * pool_size, enc_dim)        # (B, P, enc_dim)


# ----------------------------------------------------------------------------
# Decoder: single fused kernel — attention + gating + LSTMCell + fc over all timesteps
# ----------------------------------------------------------------------------
def _decoder_kernel(
    emb_ref, enc_ref, dlen_ref,
    w_enc_att_ref, b_enc_att_ref,
    w_h_ref, b_h_ref,                 # fused [w_dec_att | w_fbeta], biases
    w_full_ref, b_full_ref,           # full_att as a (1, A) row
    w_init_ref, b_init_ref,           # fused [w_init_h | w_init_c]
    w_lstm_ref, b_lstm_ref,           # fused [w_ih_emb ; w_ih_ctx ; w_hh]
    w_fc_ref, b_fc_ref,
    scores_ref, alphas_ref,
):
    T = emb_ref.shape[0]
    B, P, D = enc_ref.shape
    A = w_enc_att_ref.shape[1]
    Hd = w_fc_ref.shape[0]

    enc = enc_ref[...]                                            # (B, P, D)
    dlen = dlen_ref[...]                                          # (B, 1) int32

    # --- init h, c from mean encoder output (one fused matmul) ---
    mean_enc = jnp.mean(enc, axis=1)                              # (B, D)
    hc = (jnp.dot(mean_enc, w_init_ref[...],
                  preferred_element_type=jnp.float32) + b_init_ref[...])   # (B, 2*Hd)
    h = hc[:, :Hd]
    c = hc[:, Hd:]

    # --- precompute encoder attention projection once ---
    att1 = (jnp.dot(enc.reshape(B * P, D), w_enc_att_ref[...],
                    preferred_element_type=jnp.float32) + b_enc_att_ref[...]).reshape(B, P, A)

    w_full_row = w_full_ref[...]                                  # (1, A) — VPU broadcast row

    # Static unroll over timesteps (T is small here); for long sequences switch to
    # lax.fori_loop with dynamic leading-axis ref indexing.
    for t in range(T):
        # --- fused h projections: [att2 | f_beta gate] ---
        hproj = (jnp.dot(h, w_h_ref[...], preferred_element_type=jnp.float32)
                 + b_h_ref[...])                                  # (B, A + D)
        att2 = hproj[:, :A]                                       # (B, A)
        gate = jax.nn.sigmoid(hproj[:, A:])                       # (B, D)

        # --- soft attention over pixels (VPU mul + lane reduce, no N=1 matmul) ---
        pre = jnp.maximum(att1 + att2[:, None, :], 0.0)           # (B, P, A)
        e = jnp.sum(pre * w_full_row, axis=-1) + b_full_ref[...]  # (B, P)
        e = e - jnp.max(e, axis=-1, keepdims=True)
        p_exp = jnp.exp(e)
        denom = jnp.sum(p_exp, axis=-1, keepdims=True)
        alpha = p_exp * pl.reciprocal(denom, approx=True)         # (B, P)
        awe = jnp.sum(enc * alpha[:, :, None], axis=1)            # (B, D)
        awe = gate * awe

        # --- LSTMCell([emb; awe], (h, c)) — single fused gate matmul ---
        emb_t = emb_ref[t]                                        # (B, E)
        x_cat = jnp.concatenate([emb_t, awe, h], axis=1)          # (B, E + D + Hd)
        gates = (jnp.dot(x_cat, w_lstm_ref[...],
                         preferred_element_type=jnp.float32) + b_lstm_ref[...])  # (B, 4*Hd)
        i_g = jax.nn.sigmoid(gates[:, 0 * Hd:1 * Hd])
        f_g = jax.nn.sigmoid(gates[:, 1 * Hd:2 * Hd])
        g_g = jnp.tanh(gates[:, 2 * Hd:3 * Hd])
        o_g = jax.nn.sigmoid(gates[:, 3 * Hd:4 * Hd])
        c = f_g * c + i_g * g_g
        h = o_g * jnp.tanh(c)

        preds = (jnp.dot(h, w_fc_ref[...], preferred_element_type=jnp.float32)
                 + b_fc_ref[...])                                 # (B, V)

        # --- mask rows whose decode_length <= t (matches batch_size_t truncation) ---
        mask = t < dlen                                           # (B, 1) bool
        scores_ref[t] = jnp.where(mask, preds, 0.0)
        alphas_ref[t] = jnp.where(mask, alpha, 0.0)


def decoder_pallas(params, emb_seq, encoder_out, decode_lengths, max_dec):
    """emb_seq: (T, B, E), encoder_out: (B, P, D), decode_lengths: (B,) int32."""
    T, B, E = emb_seq.shape
    _, P, D = encoder_out.shape
    A = params["w_enc_att"].shape[1]
    Hd = params["w_hh"].shape[0]
    V = params["w_fc"].shape[1]
    assert T == max_dec
    dlen = decode_lengths.reshape(B, 1).astype(jnp.int32)

    # Host-side weight fusion (one-time, outside the kernel).
    w_h_fused = jnp.concatenate([params["w_dec_att"], params["w_fbeta"]], axis=1)      # (Hd, A+D)
    b_h_fused = jnp.concatenate([params["b_dec_att"], params["b_fbeta"]]).reshape(1, A + D)
    w_init_fused = jnp.concatenate([params["w_init_h"], params["w_init_c"]], axis=1)   # (D, 2*Hd)
    b_init_fused = jnp.concatenate([params["b_init_h"], params["b_init_c"]]).reshape(1, 2 * Hd)
    w_lstm = jnp.concatenate(
        [params["w_ih_emb"], params["w_ih_ctx"], params["w_hh"]], axis=0)              # (E+D+Hd, 4*Hd)

    n_in = 15
    scores_tbv, alphas_tbp = pl.pallas_call(
        _decoder_kernel,
        out_shape=(
            jax.ShapeDtypeStruct((T, B, V), jnp.float32),
            jax.ShapeDtypeStruct((T, B, P), jnp.float32),
        ),
        in_specs=[_VMEM] * n_in,
        out_specs=(_VMEM, _VMEM),
    )(
        emb_seq, encoder_out, dlen,
        params["w_enc_att"], params["b_enc_att"].reshape(1, A),
        w_h_fused, b_h_fused,
        params["w_full"].reshape(1, A), params["b_full"].reshape(1, 1),
        w_init_fused, b_init_fused,
        w_lstm, params["b_lstm"].reshape(1, 4 * Hd),
        params["w_fc"], params["b_fc"].reshape(1, V),
    )
    return scores_tbv, alphas_tbp


# ----------------------------------------------------------------------------
# Full PikaPikaGen forward
# ----------------------------------------------------------------------------
def pikapikagen_forward(params, images, captions, caption_lengths):
    encoder_out = encoder_forward(params, images)                 # (B, P, D)

    # decoder glue: sort by caption length (descending), like the PyTorch decoder
    cap_len = caption_lengths.reshape(-1)
    sort_ind = jnp.argsort(-cap_len)
    cap_len_sorted = cap_len[sort_ind]
    encoder_out = encoder_out[sort_ind]
    caps_sorted = captions[sort_ind]
    decode_lengths = (cap_len_sorted - 1).astype(jnp.int32)
    # NOTE: concrete python int — compute outside jax.jit (this script is not jitted).
    max_dec = int(jnp.max(decode_lengths))

    embedded = jnp.take(params["embedding"], caps_sorted, axis=0) # (B, T_cap, E)
    emb_seq = jnp.transpose(embedded[:, :max_dec, :], (1, 0, 2))  # (T, B, E) time-major

    scores_tbv, alphas_tbp = decoder_pallas(
        params, emb_seq, encoder_out, decode_lengths, max_dec)

    scores = jnp.transpose(scores_tbv, (1, 0, 2))                 # (B, T, vocab)
    alphas = jnp.transpose(alphas_tbp, (1, 0, 2))                 # (B, T, P)
    return scores, caps_sorted, decode_lengths, alphas, sort_ind


# ----------------------------------------------------------------------------
# Deterministic parameter init
# ----------------------------------------------------------------------------
def init_params(key, *, vocab=32, emb=16, enc_dim=32, dec_dim=32, att_dim=32, cin=3):
    ks = jax.random.split(key, 24)
    w = lambda k, shape, fan: jax.random.normal(k, shape, jnp.float32) / jnp.sqrt(float(fan))
    p = {}
    p["embedding"] = w(ks[0], (vocab, emb), emb)
    p["conv_w"] = w(ks[1], (3, 3, cin, enc_dim), 9 * cin)
    p["conv_b"] = 0.01 * jax.random.normal(ks[2], (enc_dim,), jnp.float32)
    p["w_enc_att"] = w(ks[3], (enc_dim, att_dim), enc_dim)
    p["b_enc_att"] = 0.01 * jax.random.normal(ks[4], (att_dim,), jnp.float32)
    p["w_dec_att"] = w(ks[5], (dec_dim, att_dim), dec_dim)
    p["b_dec_att"] = 0.01 * jax.random.normal(ks[6], (att_dim,), jnp.float32)
    p["w_full"] = w(ks[7], (att_dim, 1), att_dim)
    p["b_full"] = 0.01 * jax.random.normal(ks[8], (1,), jnp.float32)
    p["w_init_h"] = w(ks[9], (enc_dim, dec_dim), enc_dim)
    p["b_init_h"] = 0.01 * jax.random.normal(ks[10], (dec_dim,), jnp.float32)
    p["w_init_c"] = w(ks[11], (enc_dim, dec_dim), enc_dim)
    p["b_init_c"] = 0.01 * jax.random.normal(ks[12], (dec_dim,), jnp.float32)
    p["w_fbeta"] = w(ks[13], (dec_dim, enc_dim), dec_dim)
    p["b_fbeta"] = 0.01 * jax.random.normal(ks[14], (enc_dim,), jnp.float32)
    p["w_ih_emb"] = w(ks[15], (emb, 4 * dec_dim), emb + enc_dim)
    p["w_ih_ctx"] = w(ks[16], (enc_dim, 4 * dec_dim), emb + enc_dim)
    p["w_hh"] = w(ks[17], (dec_dim, 4 * dec_dim), dec_dim)
    p["b_lstm"] = (0.01 * jax.random.normal(ks[18], (4 * dec_dim,), jnp.float32)
                   + 0.01 * jax.random.normal(ks[19], (4 * dec_dim,), jnp.float32))
    p["w_fc"] = w(ks[20], (dec_dim, vocab), dec_dim)
    p["b_fc"] = 0.01 * jax.random.normal(ks[21], (vocab,), jnp.float32)
    return p


if __name__ == "__main__":
    key = jax.random.PRNGKey(0)
    B, Cin, IMG = 2, 3, 16
    VOCAB, EMB, ENC, DEC, ATT = 32, 16, 32, 32, 32
    T_CAP = 8

    params = init_params(key, vocab=VOCAB, emb=EMB, enc_dim=ENC,
                         dec_dim=DEC, att_dim=ATT, cin=Cin)

    k_img, k_cap = jax.random.split(jax.random.PRNGKey(0), 2)
    images = jax.random.normal(k_img, (B, Cin, IMG, IMG), jnp.float32)   # NCHW like PyTorch
    captions = jax.random.randint(k_cap, (B, T_CAP), 0, VOCAB, dtype=jnp.int32)
    caption_lengths = jnp.array([[8], [6]], dtype=jnp.int32)             # (B, 1) like PyTorch

    out = pikapikagen_forward(params, images, captions, caption_lengths)
    jax.block_until_ready(out)

    scores, caps_sorted, decode_lengths, alphas, sort_ind = out
    assert scores.shape == (B, 7, VOCAB)
    assert alphas.shape == (B, 7, 16)
    assert bool(jnp.all(jnp.isfinite(scores)))
    print("KERNEL_OK")
</pallas_src>

<mosaic_0001>
module attributes {stable_mosaic.version = 11 : i64} {
  func.func @_enc_matmul_kernel(%arg0: memref<512x27xf32, #tpu.memory_space<vmem>>, %arg1: memref<27x32xf32, #tpu.memory_space<vmem>>, %arg2: memref<1x32xf32, #tpu.memory_space<vmem>>, %arg3: memref<512x32xf32, #tpu.memory_space<vmem>>) attributes {dimension_semantics = [], scalar_prefetch = 0 : i64, scratch_operands = 0 : i64, tpu.core_type = #tpu.core_type<tc>} {
    %c0 = arith.constant 0 : index
    %c0_0 = arith.constant 0 : index
    %0 = vector.load %arg0[%c0, %c0_0] : memref<512x27xf32, #tpu.memory_space<vmem>>, vector<512x27xf32>
    %c0_1 = arith.constant 0 : index
    %c0_2 = arith.constant 0 : index
    %1 = vector.load %arg1[%c0_1, %c0_2] : memref<27x32xf32, #tpu.memory_space<vmem>>, vector<27x32xf32>
    %cst = arith.constant dense<0.000000e+00> : vector<512x32xf32>
    %2 = tpu.matmul %0, %1, %cst {dimension_numbers = #tpu.dot_dimension_numbers<[1], [0], [0], [1], [0, 0, 1, 1], [], []>} : vector<512x27xf32>, vector<27x32xf32>, vector<512x32xf32> -> vector<512x32xf32>
    %c0_3 = arith.constant 0 : index
    %c0_4 = arith.constant 0 : index
    %3 = vector.load %arg2[%c0_3, %c0_4] : memref<1x32xf32, #tpu.memory_space<vmem>>, vector<1x32xf32>
    %4 = vector.broadcast %3 : vector<1x32xf32> to vector<512x32xf32>
    %5 = arith.addf %2, %4 : vector<512x32xf32>
    %cst_5 = arith.constant 0.000000e+00 : f32
    %6 = vector.broadcast %cst_5 : f32 to vector<512x32xf32>
    %7 = arith.maximumf %5, %6 : vector<512x32xf32>
    %c0_6 = arith.constant 0 : index
    %c0_7 = arith.constant 0 : index
    %8 = vector.load %arg3[%c0_6, %c0_7] : memref<512x32xf32, #tpu.memory_space<vmem>>, vector<512x32xf32>
    tpu.vector_store %arg3[%c0_6, %c0_7], %7 {strides = array<i32>} : memref<512x32xf32, #tpu.memory_space<vmem>>, vector<512x32xf32>,
    return
  }
}

</mosaic_0001>

<bundles_post_ra>
// kernel: tpu_custom_call.1
= control target key start
LH: loop header
LB: loop body
LE: loop exit
PB: predicated region body
PF: predicated region fallthrough
CT: control target
= control target key end

     0   :  { %vm282_vm0 = vcmask 1042432   ;;  %vm89_vm1 = vcmask 220160   ;;  %vm735_vm2 = vcmask 261120   ;;  %s1663_s1 = inlined_call_operand.vmem [shape: f32[27,32], index: 1, kind: input, shape index: {}]   ;;  %s1664_s0 = inlined_call_operand.vmem [shape: f32[512,27], index: 0, kind: input, shape index: {}]   ;;  %s1665_s2 = inlined_call_operand.vmem [shape: f32[1,32], index: 2, kind: input, shape index: {}]   ;;  %s1666_s3 = inlined_call_operand.vmem [shape: f32[512,32], index: 3, kind: output, shape index: {}]  }
   0x1   :  { %v81_v0 = vld [vmem:[%s1663_s1 + $0x18] sm:$0x7]  ;;  %v80_v1 = vld [vmem:[%s1663_s1 + $0x10] sm:$0xff]  ;;  %v79_v2 = vld [vmem:[%s1663_s1 + $0x8] sm:$0xff] }
   0x2   :  { %938 = vmatprep.subr.msk.mxu0 %vm282_vm0, %v81_v0  ;;  %1042 = vmatprep.subr.msk.mxu1 %vm282_vm0, %v81_v0  ;;  %v78_v3 = vld [vmem:[%s1663_s1] sm:$0xff]  ;;  %v15_v6 = vld [vmem:[%s1664_s0 + $0x8] sm:$0xff]  ;;  %v16_v8 = vld [vmem:[%s1664_s0 + $0x10] sm:$0xff] }
   0x3   :  { %939 = vmatpush3.msk.msra.mxu0 %vm282_vm0, %v81_v0  ;;  %1046 = vmatpush3.msk.msra.mxu1 %vm282_vm0, %v81_v0  ;;  %v14_v4 = vld [vmem:[%s1664_s0] sm:$0xff]  ;;  %v47_v7 = vld [vmem:[%s1664_s0 + $0x108] sm:$0xff]  ;;  %v48_v9 = vld [vmem:[%s1664_s0 + $0x110] sm:$0xff] }
   0x4   :  { %940 = vmatprep.subr.mxu0 %v80_v1  ;;  %1043 = vmatprep.subr.mxu1 %v80_v1  ;;  %v46_v5 = vld [vmem:[%s1664_s0 + $0x100] sm:$0xff]  ;;  %v17_v10 = vld [vmem:[%s1664_s0 + $0x18] sm:$0xff]  ;;  %v19_v14 = vld [vmem:[%s1664_s0 + $0x28] sm:$0xff] }
   0x5   :  { %941 = vmatpush3.msra.mxu0 %v80_v1  ;;  %1047 = vmatpush3.msra.mxu1 %v80_v1  ;;  %v49_v11 = vld [vmem:[%s1664_s0 + $0x118] sm:$0xff]  ;;  %v18_v12 = vld [vmem:[%s1664_s0 + $0x20] sm:$0xff]  ;;  %v51_v15 = vld [vmem:[%s1664_s0 + $0x128] sm:$0xff] }
   0x6   :  { %942 = vmatprep.subr.mxu0 %v79_v2  ;;  %1044 = vmatprep.subr.mxu1 %v79_v2  ;;  %v50_v13 = vld [vmem:[%s1664_s0 + $0x120] sm:$0xff]  ;;  %v20_v16 = vld [vmem:[%s1664_s0 + $0x30] sm:$0xff]  ;;  %v21_v18 = vld [vmem:[%s1664_s0 + $0x38] sm:$0xff] }
   0x7   :  { %943 = vmatpush3.msra.mxu0 %v79_v2  ;;  %1048 = vmatpush3.msra.mxu1 %v79_v2  ;;  %v52_v17 = vld [vmem:[%s1664_s0 + $0x130] sm:$0xff]  ;;  %v53_v19 = vld [vmem:[%s1664_s0 + $0x138] sm:$0xff]  ;;  %v22_v20 = vld [vmem:[%s1664_s0 + $0x40] sm:$0xff] }
   0x8   :  { %944 = vmatprep.subr.mxu0 %v78_v3  ;;  %1045 = vmatprep.subr.mxu1 %v78_v3  ;;  %v54_v21 = vld [vmem:[%s1664_s0 + $0x140] sm:$0xff]  ;;  %v23_v22 = vld [vmem:[%s1664_s0 + $0x48] sm:$0xff]  ;;  %v24_v24 = vld [vmem:[%s1664_s0 + $0x50] sm:$0xff] }
   0x9   :  { %945 = vmatpush3.msra.mxu0 %v78_v3  ;;  %1049 = vmatpush3.msra.mxu1 %v78_v3  ;;  %v55_v23 = vld [vmem:[%s1664_s0 + $0x148] sm:$0xff]  ;;  %v56_v25 = vld [vmem:[%s1664_s0 + $0x150] sm:$0xff]  ;;  %v25_v26 = vld [vmem:[%s1664_s0 + $0x58] sm:$0xff] }
   0xa   :  { %946 = vmatprep.mubr.msk.f32.mxu0 %vm89_vm1, %v14_v4  ;;  %994 = vmatprep.mubr.msk.f32.mxu1 %vm89_vm1, %v46_v5  ;;  %v57_v27 = vld [vmem:[%s1664_s0 + $0x158] sm:$0xff]  ;;  %v26_v28 = vld [vmem:[%s1664_s0 + $0x60] sm:$0xff]  ;;  %v27_v30 = vld [vmem:[%s1664_s0 + $0x68] sm:$0xff] }
   0xb   :  { %947 = vmatmul.mubr.msk.f32.vlgmr.msra.gmra.mxu0 %vm89_vm1, %v15_v6  ;;  %995 = vmatmul.mubr.msk.f32.vlgmr.msra.gmra.mxu1 %vm89_vm1, %v47_v7  ;;  %v58_v29 = vld [vmem:[%s1664_s0 + $0x160] sm:$0xff]  ;;  %v59_v31 = vld [vmem:[%s1664_s0 + $0x168] sm:$0xff]  ;;  %v28_v32 = vld [vmem:[%s1664_s0 + $0x70] sm:$0xff] }
   0xc   :  { %949 = vmatprep.mubr.msk.f32.mxu0 %vm89_vm1, %v16_v8  ;;  %997 = vmatprep.mubr.msk.f32.mxu1 %vm89_vm1, %v48_v9  ;;  %v60_v33 = vld [vmem:[%s1664_s0 + $0x170] sm:$0xff]  ;;  %v29_v34 = vld [vmem:[%s1664_s0 + $0x78] sm:$0xff]  ;;  %v30_v36 = vld [vmem:[%s1664_s0 + $0x80] sm:$0xff] }
   0xd   :  { %v61_v35 = vld [vmem:[%s1664_s0 + $0x178] sm:$0xff]  ;;  %v62_v37 = vld [vmem:[%s1664_s0 + $0x180] sm:$0xff]  ;;  %v31_v38 = vld [vmem:[%s1664_s0 + $0x88] sm:$0xff] }
   0xe   :  { %v63_v39 = vld [vmem:[%s1664_s0 + $0x188] sm:$0xff]  ;;  %v32_v40 = vld [vmem:[%s1664_s0 + $0x90] sm:$0xff]  ;;  %v33_v42 = vld [vmem:[%s1664_s0 + $0x98] sm:$0xff] }
   0xf   :  { %950 = vmatmul.mubr.msk.f32.gmra.mxu0 %vm89_vm1, %v17_v10  ;;  %998 = vmatmul.mubr.msk.f32.gmra.mxu1 %vm89_vm1, %v49_v11  ;;  %v64_v41 = vld [vmem:[%s1664_s0 + $0x190] sm:$0xff]  ;;  %v65_v43 = vld [vmem:[%s1664_s0 + $0x198] sm:$0xff]  ;;  %v34_v44 = vld [vmem:[%s1664_s0 + $0xa0] sm:$0xff] }
  0x10   :  { %952 = vmatprep.mubr.msk.f32.mxu0 %vm89_vm1, %v18_v12  ;;  %1000 = vmatprep.mubr.msk.f32.mxu1 %vm89_vm1, %v50_v13  ;;  %v66_v45 = vld [vmem:[%s1664_s0 + $0x1a0] sm:$0xff]  ;;  %v35_v46 = vld [vmem:[%s1664_s0 + $0xa8] sm:$0xff]  ;;  %v36_v48 = vld [vmem:[%s1664_s0 + $0xb0] sm:$0xff] }
  0x11   :  { %v67_v47 = vld [vmem:[%s1664_s0 + $0x1a8] sm:$0xff]  ;;  %v68_v49 = vld [vmem:[%s1664_s0 + $0x1b0] sm:$0xff]  ;;  %v37_v50 = vld [vmem:[%s1664_s0 + $0xb8] sm:$0xff] }
  0x12   :  { %v69_v51 = vld [vmem:[%s1664_s0 + $0x1b8] sm:$0xff]  ;;  %v38_v52 = vld [vmem:[%s1664_s0 + $0xc0] sm:$0xff]  ;;  %v39_v54 = vld [vmem:[%s1664_s0 + $0xc8] sm:$0xff] }
  0x13   :  { %953 = vmatmul.mubr.msk.f32.gmra.mxu0 %vm89_vm1, %v19_v14  ;;  %1001 = vmatmul.mubr.msk.f32.gmra.mxu1 %vm89_vm1, %v51_v15  ;;  %v70_v53 = vld [vmem:[%s1664_s0 + $0x1c0] sm:$0xff]  ;;  %v71_v55 = vld [vmem:[%s1664_s0 + $0x1c8] sm:$0xff]  ;;  %v40_v56 = vld [vmem:[%s1664_s0 + $0xd0] sm:$0xff] }
  0x14   :  { %955 = vmatprep.mubr.msk.f32.mxu0 %vm89_vm1, %v20_v16  ;;  %1003 = vmatprep.mubr.msk.f32.mxu1 %vm89_vm1, %v52_v17  ;;  %v72_v57 = vld [vmem:[%s1664_s0 + $0x1d0] sm:$0xff]  ;;  %v41_v58 = vld [vmem:[%s1664_s0 + $0xd8] sm:$0xff]  ;;  %v42_v60 = vld [vmem:[%s1664_s0 + $0xe0] sm:$0xff] }
  0x15   :  { %v73_v59 = vld [vmem:[%s1664_s0 + $0x1d8] sm:$0xff]  ;;  %v74_v61 = vld [vmem:[%s1664_s0 + $0x1e0] sm:$0xff]  ;;  %v43_v62 = vld [vmem:[%s1664_s0 + $0xe8] sm:$0xff] }
  0x16   :  { %v75_v63 = vld [vmem:[%s1664_s0 + $0x1e8] sm:$0xff]  ;;  %v44_v0 = vld [vmem:[%s1664_s0 + $0xf0] sm:$0xff]  ;;  %v45_v2 = vld [vmem:[%s1664_s0 + $0xf8] sm:$0xff] }
  0x17   :  { %956 = vmatmul.mubr.msk.f32.gmra.mxu0 %vm89_vm1, %v21_v18  ;;  %1004 = vmatmul.mubr.msk.f32.gmra.mxu1 %vm89_vm1, %v53_v19  ;;  %v76_v1 = vld [vmem:[%s1664_s0 + $0x1f0] sm:$0xff]  ;;  %v77_v3 = vld [vmem:[%s1664_s0 + $0x1f8] sm:$0xff]  ;;  %v1341_v4 = vld [vmem:[%s1665_s2] ss:$0 sm:$0xff] }
  0x18   :  { %958 = vmatprep.mubr.msk.f32.mxu0 %vm89_vm1, %v22_v20  ;;  %1006 = vmatprep.mubr.msk.f32.mxu1 %vm89_vm1, %v54_v21 }
  0x1b   :  { %959 = vmatmul.mubr.msk.f32.gmra.mxu0 %vm89_vm1, %v23_v22  ;;  %1007 = vmatmul.mubr.msk.f32.gmra.mxu1 %vm89_vm1, %v55_v23 }
  0x1c   :  { %961 = vmatprep.mubr.msk.f32.mxu0 %vm89_vm1, %v24_v24  ;;  %1009 = vmatprep.mubr.msk.f32.mxu1 %vm89_vm1, %v56_v25 }
  0x1f   :  { %962 = vmatmul.mubr.msk.f32.gmra.mxu0 %vm89_vm1, %v25_v26  ;;  %1010 = vmatmul.mubr.msk.f32.gmra.mxu1 %vm89_vm1, %v57_v27 }
  0x20   :  { %964 = vmatprep.mubr.msk.f32.mxu0 %vm89_vm1, %v26_v28  ;;  %1012 = vmatprep.mubr.msk.f32.mxu1 %vm89_vm1, %v58_v29 }
  0x23   :  { %965 = vmatmul.mubr.msk.f32.gmra.mxu0 %vm89_vm1, %v27_v30  ;;  %1013 = vmatmul.mubr.msk.f32.gmra.mxu1 %vm89_vm1, %v59_v31 }
  0x24   :  { %967 = vmatprep.mubr.msk.f32.mxu0 %vm89_vm1, %v28_v32  ;;  %1015 = vmatprep.mubr.msk.f32.mxu1 %vm89_vm1, %v60_v33 }
  0x27   :  { %968 = vmatmul.mubr.msk.f32.gmra.mxu0 %vm89_vm1, %v29_v34  ;;  %1016 = vmatmul.mubr.msk.f32.gmra.mxu1 %vm89_vm1, %v61_v35 }
  0x28   :  { %970 = vmatprep.mubr.msk.f32.mxu0 %vm89_vm1, %v30_v36  ;;  %1018 = vmatprep.mubr.msk.f32.mxu1 %vm89_vm1, %v62_v37 }
  0x2b   :  { %971 = vmatmul.mubr.msk.f32.gmra.mxu0 %vm89_vm1, %v31_v38  ;;  %1019 = vmatmul.mubr.msk.f32.gmra.mxu1 %vm89_vm1, %v63_v39 }
  0x2c   :  { %973 = vmatprep.mubr.msk.f32.mxu0 %vm89_vm1, %v32_v40  ;;  %1021 = vmatprep.mubr.msk.f32.mxu1 %vm89_vm1, %v64_v41 }
  0x2f   :  { %974 = vmatmul.mubr.msk.f32.gmra.mxu0 %vm89_vm1, %v33_v42  ;;  %1022 = vmatmul.mubr.msk.f32.gmra.mxu1 %vm89_vm1, %v65_v43 }
  0x30   :  { %976 = vmatprep.mubr.msk.f32.mxu0 %vm89_vm1, %v34_v44  ;;  %1024 = vmatprep.mubr.msk.f32.mxu1 %vm89_vm1, %v66_v45 }
  0x33   :  { %977 = vmatmul.mubr.msk.f32.gmra.mxu0 %vm89_vm1, %v35_v46  ;;  %1025 = vmatmul.mubr.msk.f32.gmra.mxu1 %vm89_vm1, %v67_v47 }
  0x34   :  { %979 = vmatprep.mubr.msk.f32.mxu0 %vm89_vm1, %v36_v48  ;;  %1027 = vmatprep.mubr.msk.f32.mxu1 %vm89_vm1, %v68_v49 }
  0x37   :  { %980 = vmatmul.mubr.msk.f32.gmra.mxu0 %vm89_vm1, %v37_v50  ;;  %1028 = vmatmul.mubr.msk.f32.gmra.mxu1 %vm89_vm1, %v69_v51 }
  0x38   :  { %982 = vmatprep.mubr.msk.f32.mxu0 %vm89_vm1, %v38_v52  ;;  %1030 = vmatprep.mubr.msk.f32.mxu1 %vm89_vm1, %v70_v53 }
  0x3b   :  { %983 = vmatmul.mubr.msk.f32.gmra.mxu0 %vm89_vm1, %v39_v54  ;;  %1031 = vmatmul.mubr.msk.f32.gmra.mxu1 %vm89_vm1, %v71_v55 }
  0x3c   :  { %985 = vmatprep.mubr.msk.f32.mxu0 %vm89_vm1, %v40_v56  ;;  %1033 = vmatprep.mubr.msk.f32.mxu1 %vm89_vm1, %v72_v57 }
  0x3f   :  { %986 = vmatmul.mubr.msk.f32.gmra.mxu0 %vm89_vm1, %v41_v58  ;;  %1034 = vmatmul.mubr.msk.f32.gmra.mxu1 %vm89_vm1, %v73_v59 }
  0x40   :  { %988 = vmatprep.mubr.msk.f32.mxu0 %vm89_vm1, %v42_v60  ;;  %1036 = vmatprep.mubr.msk.f32.mxu1 %vm89_vm1, %v74_v61 }
  0x43   :  { %989 = vmatmul.mubr.msk.f32.gmra.mxu0 %vm89_vm1, %v43_v62  ;;  %1037 = vmatmul.mubr.msk.f32.gmra.mxu1 %vm89_vm1, %v75_v63 }
  0x44   :  { %991 = vmatprep.mubr.msk.f32.mxu0 %vm89_vm1, %v44_v0  ;;  %1039 = vmatprep.mubr.msk.f32.mxu1 %vm89_vm1, %v76_v1 }
  0x47   :  { %992 = vmatmul.mubr.msk.f32.gmra.mxu0 %vm89_vm1, %v45_v2  ;;  %1040 = vmatmul.mubr.msk.f32.gmra.mxu1 %vm89_vm1, %v77_v3 }
  0xcb   :  { %v948_v5 = vpop.f32.mrf.mxu0  ;;  %v996_v6 = vpop.f32.mrf.mxu1 }
  0xcc   :  { %v358_v7 = vadd.f32 %v948_v5, %v1341_v4  ;;  %v518_v8 = vadd.f32 %v996_v6, %v1341_v4 }
  0xcd   :  { %v352_v9 = vpop.f32.mrf.mxu0  ;;  %v512_v10 = vpop.f32.mrf.mxu1 }
  0xce   :  { %v672_v11 = vmax.f32 %v358_v7, 0.0  ;;  %v704_v12 = vmax.f32 %v518_v8, 0.0  ;;  %v353_v13 = vadd.f32 %v1341_v4, %v352_v9  ;;  %v513_v14 = vadd.f32 %v1341_v4, %v512_v10 }
  0xcf   :  { %v951_v15 = vpop.f32.mrf.mxu0  ;;  %v999_v16 = vpop.f32.mrf.mxu1 }
  0xd0   :  { %737 = vst.msk [vmem:[%s1666_s3 + $0x8] sm:$0xff] %vm735_vm2, %v672_v11  ;;  %769 = vst.msk [vmem:[%s1666_s3 + $0x108] sm:$0xff] %vm735_vm2, %v704_v12  ;;  %v671_v17 = vmax.f32 %v353_v13, 0.0  ;;  %v703_v18 = vmax.f32 %v513_v14, 0.0  ;;  %v368_v19 = vadd.f32 %v951_v15, %v1341_v4  ;;  %v528_v20 = vadd.f32 %v999_v16, %v1341_v4 }
  0xd1   :  { %v362_v21 = vpop.f32.mrf.mxu0  ;;  %v522_v22 = vpop.f32.mrf.mxu1 }
  0xd2   :  { %736 = vst.msk [vmem:[%s1666_s3] sm:$0xff] %vm735_vm2, %v671_v17  ;;  %768 = vst.msk [vmem:[%s1666_s3 + $0x100] sm:$0xff] %vm735_vm2, %v703_v18  ;;  %v674_v23 = vmax.f32 %v368_v19, 0.0  ;;  %v706_v24 = vmax.f32 %v528_v20, 0.0  ;;  %v363_v25 = vadd.f32 %v1341_v4, %v362_v21  ;;  %v523_v26 = vadd.f32 %v1341_v4, %v522_v22 }
  0xd3   :  { %v954_v27 = vpop.f32.mrf.mxu0  ;;  %v1002_v28 = vpop.f32.mrf.mxu1 }
  0xd4   :  { %739 = vst.msk [vmem:[%s1666_s3 + $0x18] sm:$0xff] %vm735_vm2, %v674_v23  ;;  %771 = vst.msk [vmem:[%s1666_s3 + $0x118] sm:$0xff] %vm735_vm2, %v706_v24  ;;  %v673_v29 = vmax.f32 %v363_v25, 0.0  ;;  %v705_v30 = vmax.f32 %v523_v26, 0.0  ;;  %v378_v31 = vadd.f32 %v954_v27, %v1341_v4  ;;  %v538_v32 = vadd.f32 %v1002_v28, %v1341_v4 }
  0xd5   :  { %v372_v33 = vpop.f32.mrf.mxu0  ;;  %v532_v34 = vpop.f32.mrf.mxu1 }
  0xd6   :  { %738 = vst.msk [vmem:[%s1666_s3 + $0x10] sm:$0xff] %vm735_vm2, %v673_v29  ;;  %770 = vst.msk [vmem:[%s1666_s3 + $0x110] sm:$0xff] %vm735_vm2, %v705_v30  ;;  %v676_v35 = vmax.f32 %v378_v31, 0.0  ;;  %v708_v36 = vmax.f32 %v538_v32, 0.0  ;;  %v373_v37 = vadd.f32 %v1341_v4, %v372_v33  ;;  %v533_v38 = vadd.f32 %v1341_v4, %v532_v34 }
  0xd7   :  { %v957_v39 = vpop.f32.mrf.mxu0  ;;  %v1005_v40 = vpop.f32.mrf.mxu1 }
  0xd8   :  { %741 = vst.msk [vmem:[%s1666_s3 + $0x28] sm:$0xff] %vm735_vm2, %v676_v35  ;;  %773 = vst.msk [vmem:[%s1666_s3 + $0x128] sm:$0xff] %vm735_vm2, %v708_v36  ;;  %v675_v41 = vmax.f32 %v373_v37, 0.0  ;;  %v707_v42 = vmax.f32 %v533_v38, 0.0  ;;  %v388_v43 = vadd.f32 %v957_v39, %v1341_v4  ;;  %v548_v44 = vadd.f32 %v1005_v40, %v1341_v4 }
  0xd9   :  { %v382_v45 = vpop.f32.mrf.mxu0  ;;  %v542_v46 = vpop.f32.mrf.mxu1 }
  0xda   :  { %740 = vst.msk [vmem:[%s1666_s3 + $0x20] sm:$0xff] %vm735_vm2, %v675_v41  ;;  %772 = vst.msk [vmem:[%s1666_s3 + $0x120] sm:$0xff] %vm735_vm2, %v707_v42  ;;  %v678_v47 = vmax.f32 %v388_v43, 0.0  ;;  %v710_v48 = vmax.f32 %v548_v44, 0.0  ;;  %v383_v49 = vadd.f32 %v1341_v4, %v382_v45  ;;  %v543_v50 = vadd.f32 %v1341_v4, %v542_v46 }
  0xdb   :  { %v960_v51 = vpop.f32.mrf.mxu0  ;;  %v1008_v52 = vpop.f32.mrf.mxu1 }
  0xdc   :  { %743 = vst.msk [vmem:[%s1666_s3 + $0x38] sm:$0xff] %vm735_vm2, %v678_v47  ;;  %775 = vst.msk [vmem:[%s1666_s3 + $0x138] sm:$0xff] %vm735_vm2, %v710_v48  ;;  %v677_v53 = vmax.f32 %v383_v49, 0.0  ;;  %v709_v54 = vmax.f32 %v543_v50, 0.0  ;;  %v398_v55 = vadd.f32 %v960_v51, %v1341_v4  ;;  %v558_v56 = vadd.f32 %v1008_v52, %v1341_v4 }
  0xdd   :  { %v392_v57 = vpop.f32.mrf.mxu0  ;;  %v552_v58 = vpop.f32.mrf.mxu1 }
  0xde   :  { %742 = vst.msk [vmem:[%s1666_s3 + $0x30] sm:$0xff] %vm735_vm2, %v677_v53  ;;  %774 = vst.msk [vmem:[%s1666_s3 + $0x130] sm:$0xff] %vm735_vm2, %v709_v54  ;;  %v680_v59 = vmax.f32 %v398_v55, 0.0  ;;  %v712_v60 = vmax.f32 %v558_v56, 0.0  ;;  %v393_v61 = vadd.f32 %v1341_v4, %v392_v57  ;;  %v553_v62 = vadd.f32 %v1341_v4, %v552_v58 }
  0xdf   :  { %v963_v63 = vpop.f32.mrf.mxu0  ;;  %v1011_v0 = vpop.f32.mrf.mxu1 }
  0xe0   :  { %745 = vst.msk [vmem:[%s1666_s3 + $0x48] sm:$0xff] %vm735_vm2, %v680_v59  ;;  %777 = vst.msk [vmem:[%s1666_s3 + $0x148] sm:$0xff] %vm735_vm2, %v712_v60  ;;  %v679_v1 = vmax.f32 %v393_v61, 0.0  ;;  %v711_v2 = vmax.f32 %v553_v62, 0.0  ;;  %v408_v3 = vadd.f32 %v963_v63, %v1341_v4  ;;  %v568_v5 = vadd.f32 %v1011_v0, %v1341_v4 }
  0xe1   :  { %v402_v6 = vpop.f32.mrf.mxu0  ;;  %v562_v7 = vpop.f32.mrf.mxu1 }
  0xe2   :  { %744 = vst.msk [vmem:[%s1666_s3 + $0x40] sm:$0xff] %vm735_vm2, %v679_v1  ;;  %776 = vst.msk [vmem:[%s1666_s3 + $0x140] sm:$0xff] %vm735_vm2, %v711_v2  ;;  %v682_v8 = vmax.f32 %v408_v3, 0.0  ;;  %v714_v9 = vmax.f32 %v568_v5, 0.0  ;;  %v403_v10 = vadd.f32 %v1341_v4, %v402_v6  ;;  %v563_v11 = vadd.f32 %v1341_v4, %v562_v7 }
  0xe3   :  { %v966_v12 = vpop.f32.mrf.mxu0  ;;  %v1014_v13 = vpop.f32.mrf.mxu1 }
  0xe4   :  { %747 = vst.msk [vmem:[%s1666_s3 + $0x58] sm:$0xff] %vm735_vm2, %v682_v8  ;;  %779 = vst.msk [vmem:[%s1666_s3 + $0x158] sm:$0xff] %vm735_vm2, %v714_v9  ;;  %v681_v14 = vmax.f32 %v403_v10, 0.0  ;;  %v713_v15 = vmax.f32 %v563_v11, 0.0  ;;  %v418_v16 = vadd.f32 %v966_v12, %v1341_v4  ;;  %v578_v17 = vadd.f32 %v1014_v13, %v1341_v4 }
  0xe5   :  { %v412_v18 = vpop.f32.mrf.mxu0  ;;  %v572_v19 = vpop.f32.mrf.mxu1 }
  0xe6   :  { %746 = vst.msk [vmem:[%s1666_s3 + $0x50] sm:$0xff] %vm735_vm2, %v681_v14  ;;  %778 = vst.msk [vmem:[%s1666_s3 + $0x150] sm:$0xff] %vm735_vm2, %v713_v15  ;;  %v684_v20 = vmax.f32 %v418_v16, 0.0  ;;  %v716_v21 = vmax.f32 %v578_v17, 0.0  ;;  %v413_v22 = vadd.f32 %v1341_v4, %v412_v18  ;;  %v573_v23 = vadd.f32 %v1341_v4, %v572_v19 }
  0xe7   :  { %v969_v24 = vpop.f32.mrf.mxu0  ;;  %v1017_v25 = vpop.f32.mrf.mxu1 }
  0xe8   :  { %749 = vst.msk [vmem:[%s1666_s3 + $0x68] sm:$0xff] %vm735_vm2, %v684_v20  ;;  %781 = vst.msk [vmem:[%s1666_s3 + $0x168] sm:$0xff] %vm735_vm2, %v716_v21  ;;  %v683_v26 = vmax.f32 %v413_v22, 0.0  ;;  %v715_v27 = vmax.f32 %v573_v23, 0.0  ;;  %v428_v28 = vadd.f32 %v969_v24, %v1341_v4  ;;  %v588_v29 = vadd.f32 %v1017_v25, %v1341_v4 }
  0xe9   :  { %v422_v30 = vpop.f32.mrf.mxu0  ;;  %v582_v31 = vpop.f32.mrf.mxu1 }
  0xea   :  { %748 = vst.msk [vmem:[%s1666_s3 + $0x60] sm:$0xff] %vm735_vm2, %v683_v26  ;;  %780 = vst.msk [vmem:[%s1666_s3 + $0x160] sm:$0xff] %vm735_vm2, %v715_v27  ;;  %v686_v32 = vmax.f32 %v428_v28, 0.0  ;;  %v718_v33 = vmax.f32 %v588_v29, 0.0  ;;  %v423_v34 = vadd.f32 %v1341_v4, %v422_v30  ;;  %v583_v35 = vadd.f32 %v1341_v4, %v582_v31 }
  0xeb   :  { %v972_v36 = vpop.f32.mrf.mxu0  ;;  %v1020_v37 = vpop.f32.mrf.mxu1 }
  0xec   :  { %751 = vst.msk [vmem:[%s1666_s3 + $0x78] sm:$0xff] %vm735_vm2, %v686_v32  ;;  %783 = vst.msk [vmem:[%s1666_s3 + $0x178] sm:$0xff] %vm735_vm2, %v718_v33  ;;  %v685_v38 = vmax.f32 %v423_v34, 0.0  ;;  %v717_v39 = vmax.f32 %v583_v35, 0.0  ;;  %v438_v40 = vadd.f32 %v972_v36, %v1341_v4  ;;  %v598_v41 = vadd.f32 %v1020_v37, %v1341_v4 }
  0xed   :  { %v432_v42 = vpop.f32.mrf.mxu0  ;;  %v592_v43 = vpop.f32.mrf.mxu1 }
  0xee   :  { %750 = vst.msk [vmem:[%s1666_s3 + $0x70] sm:$0xff] %vm735_vm2, %v685_v38  ;;  %782 = vst.msk [vmem:[%s1666_s3 + $0x170] sm:$0xff] %vm735_vm2, %v717_v39  ;;  %v688_v44 = vmax.f32 %v438_v40, 0.0  ;;  %v720_v45 = vmax.f32 %v598_v41, 0.0  ;;  %v433_v46 = vadd.f32 %v1341_v4, %v432_v42  ;;  %v593_v47 = vadd.f32 %v1341_v4, %v592_v43 }
  0xef   :  { %v975_v48 = vpop.f32.mrf.mxu0  ;;  %v1023_v49 = vpop.f32.mrf.mxu1 }
  0xf0   :  { %753 = vst.msk [vmem:[%s1666_s3 + $0x88] sm:$0xff] %vm735_vm2, %v688_v44  ;;  %785 = vst.msk [vmem:[%s1666_s3 + $0x188] sm:$0xff] %vm735_vm2, %v720_v45  ;;  %v687_v50 = vmax.f32 %v433_v46, 0.0  ;;  %v719_v51 = vmax.f32 %v593_v47, 0.0  ;;  %v448_v52 = vadd.f32 %v975_v48, %v1341_v4  ;;  %v608_v53 = vadd.f32 %v1023_v49, %v1341_v4 }
  0xf1   :  { %v442_v54 = vpop.f32.mrf.mxu0  ;;  %v602_v55 = vpop.f32.mrf.mxu1 }
  0xf2   :  { %752 = vst.msk [vmem:[%s1666_s3 + $0x80] sm:$0xff] %vm735_vm2, %v687_v50  ;;  %784 = vst.msk [vmem:[%s1666_s3 + $0x180] sm:$0xff] %vm735_vm2, %v719_v51  ;;  %v690_v56 = vmax.f32 %v448_v52, 0.0  ;;  %v722_v57 = vmax.f32 %v608_v53, 0.0  ;;  %v443_v58 = vadd.f32 %v1341_v4, %v442_v54  ;;  %v603_v59 = vadd.f32 %v1341_v4, %v602_v55 }
  0xf3   :  { %v978_v60 = vpop.f32.mrf.mxu0  ;;  %v1026_v61 = vpop.f32.mrf.mxu1 }
  0xf4   :  { %755 = vst.msk [vmem:[%s1666_s3 + $0x98] sm:$0xff] %vm735_vm2, %v690_v56  ;;  %787 = vst.msk [vmem:[%s1666_s3 + $0x198] sm:$0xff] %vm735_vm2, %v722_v57  ;;  %v689_v62 = vmax.f32 %v443_v58, 0.0  ;;  %v721_v63 = vmax.f32 %v603_v59, 0.0  ;;  %v458_v0 = vadd.f32 %v978_v60, %v1341_v4  ;;  %v618_v1 = vadd.f32 %v1026_v61, %v1341_v4 }
  0xf5   :  { %v452_v2 = vpop.f32.mrf.mxu0  ;;  %v612_v3 = vpop.f32.mrf.mxu1 }
  0xf6   :  { %754 = vst.msk [vmem:[%s1666_s3 + $0x90] sm:$0xff] %vm735_vm2, %v689_v62  ;;  %786 = vst.msk [vmem:[%s1666_s3 + $0x190] sm:$0xff] %vm735_vm2, %v721_v63  ;;  %v692_v5 = vmax.f32 %v458_v0, 0.0  ;;  %v724_v6 = vmax.f32 %v618_v1, 0.0  ;;  %v453_v7 = vadd.f32 %v1341_v4, %v452_v2  ;;  %v613_v8 = vadd.f32 %v1341_v4, %v612_v3 }
  0xf7   :  { %v981_v9 = vpop.f32.mrf.mxu0  ;;  %v1029_v10 = vpop.f32.mrf.mxu1 }
  0xf8   :  { %757 = vst.msk [vmem:[%s1666_s3 + $0xa8] sm:$0xff] %vm735_vm2, %v692_v5  ;;  %789 = vst.msk [vmem:[%s1666_s3 + $0x1a8] sm:$0xff] %vm735_vm2, %v724_v6  ;;  %v691_v11 = vmax.f32 %v453_v7, 0.0  ;;  %v723_v12 = vmax.f32 %v613_v8, 0.0  ;;  %v468_v13 = vadd.f32 %v981_v9, %v1341_v4  ;;  %v628_v14 = vadd.f32 %v1029_v10, %v1341_v4 }
  0xf9   :  { %v462_v15 = vpop.f32.mrf.mxu0  ;;  %v622_v16 = vpop.f32.mrf.mxu1 }
  0xfa   :  { %756 = vst.msk [vmem:[%s1666_s3 + $0xa0] sm:$0xff] %vm735_vm2, %v691_v11  ;;  %788 = vst.msk [vmem:[%s1666_s3 + $0x1a0] sm:$0xff] %vm735_vm2, %v723_v12  ;;  %v694_v17 = vmax.f32 %v468_v13, 0.0  ;;  %v726_v18 = vmax.f32 %v628_v14, 0.0  ;;  %v463_v19 = vadd.f32 %v1341_v4, %v462_v15  ;;  %v623_v20 = vadd.f32 %v1341_v4, %v622_v16 }
  0xfb   :  { %v984_v21 = vpop.f32.mrf.mxu0  ;;  %v1032_v22 = vpop.f32.mrf.mxu1 }
  0xfc   :  { %759 = vst.msk [vmem:[%s1666_s3 + $0xb8] sm:$0xff] %vm735_vm2, %v694_v17  ;;  %791 = vst.msk [vmem:[%s1666_s3 + $0x1b8] sm:$0xff] %vm735_vm2, %v726_v18  ;;  %v693_v23 = vmax.f32 %v463_v19, 0.0  ;;  %v725_v24 = vmax.f32 %v623_v20, 0.0  ;;  %v478_v25 = vadd.f32 %v984_v21, %v1341_v4  ;;  %v638_v26 = vadd.f32 %v1032_v22, %v1341_v4 }
  0xfd   :  { %v472_v27 = vpop.f32.mrf.mxu0  ;;  %v632_v28 = vpop.f32.mrf.mxu1 }
  0xfe   :  { %758 = vst.msk [vmem:[%s1666_s3 + $0xb0] sm:$0xff] %vm735_vm2, %v693_v23  ;;  %790 = vst.msk [vmem:[%s1666_s3 + $0x1b0] sm:$0xff] %vm735_vm2, %v725_v24  ;;  %v696_v29 = vmax.f32 %v478_v25, 0.0  ;;  %v728_v30 = vmax.f32 %v638_v26, 0.0  ;;  %v473_v31 = vadd.f32 %v1341_v4, %v472_v27  ;;  %v633_v32 = vadd.f32 %v1341_v4, %v632_v28 }
  0xff   :  { %v987_v33 = vpop.f32.mrf.mxu0  ;;  %v1035_v34 = vpop.f32.mrf.mxu1 }
 0x100   :  { %761 = vst.msk [vmem:[%s1666_s3 + $0xc8] sm:$0xff] %vm735_vm2, %v696_v29  ;;  %793 = vst.msk [vmem:[%s1666_s3 + $0x1c8] sm:$0xff] %vm735_vm2, %v728_v30  ;;  %v695_v35 = vmax.f32 %v473_v31, 0.0  ;;  %v727_v36 = vmax.f32 %v633_v32, 0.0  ;;  %v488_v37 = vadd.f32 %v987_v33, %v1341_v4  ;;  %v648_v38 = vadd.f32 %v1035_v34, %v1341_v4 }
 0x101   :  { %v482_v39 = vpop.f32.mrf.mxu0  ;;  %v642_v40 = vpop.f32.mrf.mxu1 }
 0x102   :  { %760 = vst.msk [vmem:[%s1666_s3 + $0xc0] sm:$0xff] %vm735_vm2, %v695_v35  ;;  %792 = vst.msk [vmem:[%s1666_s3 + $0x1c0] sm:$0xff] %vm735_vm2, %v727_v36  ;;  %v698_v41 = vmax.f32 %v488_v37, 0.0  ;;  %v730_v42 = vmax.f32 %v648_v38, 0.0  ;;  %v483_v43 = vadd.f32 %v1341_v4, %v482_v39  ;;  %v643_v44 = vadd.f32 %v1341_v4, %v642_v40 }
 0x103   :  { %v990_v45 = vpop.f32.mrf.mxu0  ;;  %v1038_v46 = vpop.f32.mrf.mxu1 }
 0x104   :  { %763 = vst.msk [vmem:[%s1666_s3 + $0xd8] sm:$0xff] %vm735_vm2, %v698_v41  ;;  %795 = vst.msk [vmem:[%s1666_s3 + $0x1d8] sm:$0xff] %vm735_vm2, %v730_v42  ;;  %v697_v47 = vmax.f32 %v483_v43, 0.0  ;;  %v729_v48 = vmax.f32 %v643_v44, 0.0  ;;  %v498_v49 = vadd.f32 %v990_v45, %v1341_v4  ;;  %v658_v50 = vadd.f32 %v1038_v46, %v1341_v4 }
 0x105   :  { %v492_v51 = vpop.f32.mrf.mxu0  ;;  %v652_v52 = vpop.f32.mrf.mxu1 }
 0x106   :  { %762 = vst.msk [vmem:[%s1666_s3 + $0xd0] sm:$0xff] %vm735_vm2, %v697_v47  ;;  %794 = vst.msk [vmem:[%s1666_s3 + $0x1d0] sm:$0xff] %vm735_vm2, %v729_v48  ;;  %v700_v53 = vmax.f32 %v498_v49, 0.0  ;;  %v732_v54 = vmax.f32 %v658_v50, 0.0  ;;  %v493_v55 = vadd.f32 %v1341_v4, %v492_v51  ;;  %v653_v56 = vadd.f32 %v1341_v4, %v652_v52 }
 0x107   :  { %v993_v57 = vpop.f32.mrf.mxu0  ;;  %v1041_v58 = vpop.f32.mrf.mxu1 }
 0x108   :  { %765 = vst.msk [vmem:[%s1666_s3 + $0xe8] sm:$0xff] %vm735_vm2, %v700_v53  ;;  %797 = vst.msk [vmem:[%s1666_s3 + $0x1e8] sm:$0xff] %vm735_vm2, %v732_v54  ;;  %v699_v59 = vmax.f32 %v493_v55, 0.0  ;;  %v731_v60 = vmax.f32 %v653_v56, 0.0  ;;  %v508_v61 = vadd.f32 %v993_v57, %v1341_v4  ;;  %v668_v62 = vadd.f32 %v1041_v58, %v1341_v4 }
 0x109   :  { %v502_v63 = vpop.f32.mrf.mxu0  ;;  %v662_v0 = vpop.f32.mrf.mxu1 }
 0x10a   :  { %764 = vst.msk [vmem:[%s1666_s3 + $0xe0] sm:$0xff] %vm735_vm2, %v699_v59  ;;  %796 = vst.msk [vmem:[%s1666_s3 + $0x1e0] sm:$0xff] %vm735_vm2, %v731_v60  ;;  %v702_v1 = vmax.f32 %v508_v61, 0.0  ;;  %v734_v2 = vmax.f32 %v668_v62, 0.0  ;;  %v503_v3 = vadd.f32 %v1341_v4, %v502_v63  ;;  %v663_v5 = vadd.f32 %v1341_v4, %v662_v0 }
 0x10c   :  { %767 = vst.msk [vmem:[%s1666_s3 + $0xf8] sm:$0xff] %vm735_vm2, %v702_v1  ;;  %799 = vst.msk [vmem:[%s1666_s3 + $0x1f8] sm:$0xff] %vm735_vm2, %v734_v2  ;;  %v701_v6 = vmax.f32 %v503_v3, 0.0  ;;  %v733_v7 = vmax.f32 %v663_v5, 0.0 }
 0x10e   :  { %766 = vst.msk [vmem:[%s1666_s3 + $0xf0] sm:$0xff] %vm735_vm2, %v701_v6  ;;  %798 = vst.msk [vmem:[%s1666_s3 + $0x1f0] sm:$0xff] %vm735_vm2, %v733_v7 }

</bundles_post_ra>
